<compile_context>
chip_gen: v7x
topology: tpu7x:2x2x1
jax: 0.10.0
libtpu: 0.0.40
codegen_flags: <defaults>
</compile_context>

<pallas_src>
import numpy as np
import jax
import jax.numpy as jnp
from jax.experimental import pallas as pl
from jax.experimental.pallas import tpu as pltpu


# ----------------------------- Pallas kernel --------------------------------
def textdnn_kernel(xT_ref,              # (2E, TB)  bf16  -- batch on lanes
                   wf_ref, bf_ref,      # (H1, 2E) bf16, (H1, 1) f32  fused fc1+conv+pool
                   w2_ref, b2_ref,      # (H2, H1) bf16, (H2, 1) f32
                   w3_ref, b3_ref,      # (H3, H2) bf16, (H3, 1) f32
                   w4_ref, b4_ref,      # (E,  H3) bf16, (E,  1) f32
                   outT_ref):           # (E, TB)  f32
    xT = xT_ref[...]
    # fused fc1 + conv1d(1,1,3) + adaptive avg-pool, then relu  -> (H1, TB)
    h = jnp.maximum(
        jnp.dot(wf_ref[...], xT, preferred_element_type=jnp.float32) + bf_ref[...],
        0.0)
    # fc2 + relu  -> (H2, TB)
    h = jnp.maximum(
        jnp.dot(w2_ref[...], h.astype(jnp.bfloat16),
                preferred_element_type=jnp.float32) + b2_ref[...], 0.0)
    # fc3 + relu  -> (H3, TB)
    h = jnp.maximum(
        jnp.dot(w3_ref[...], h.astype(jnp.bfloat16),
                preferred_element_type=jnp.float32) + b3_ref[...], 0.0)
    # fc4  -> (E, TB), lane-dense unmasked store
    outT_ref[...] = (
        jnp.dot(w4_ref[...], h.astype(jnp.bfloat16),
                preferred_element_type=jnp.float32) + b4_ref[...]
    ).astype(outT_ref.dtype)


# ------------------------------- utilities ----------------------------------
def _round_up(n, m):
    return ((n + m - 1) // m) * m


def adaptive_avg_pool1d_matrix(length, out_size):
    """(length, out_size) matrix implementing PyTorch AdaptiveAvgPool1d exactly."""
    P = np.zeros((length, out_size), dtype=np.float32)
    for i in range(out_size):
        start = (i * length) // out_size
        end = -((-(i + 1) * length) // out_size)   # ceil((i+1)*L/out)
        P[start:end, i] = 1.0 / (end - start)
    return jnp.asarray(P)


def init_params(key, E, H0, H1, H2, H3):
    """Deterministic init mimicking PyTorch default (uniform +-1/sqrt(fan_in))."""
    ks = jax.random.split(key, 10)

    def linear(kw, kb, fan_in, fan_out):
        bound = 1.0 / np.sqrt(fan_in)
        W = jax.random.uniform(kw, (fan_in, fan_out), jnp.float32, -bound, bound)
        b = jax.random.uniform(kb, (1, fan_out), jnp.float32, -bound, bound)
        return W, b

    w1, b1 = linear(ks[0], ks[1], 2 * E, H0)
    conv_bound = 1.0 / np.sqrt(1 * 3)
    conv_w = jax.random.uniform(ks[2], (3,), jnp.float32, -conv_bound, conv_bound)
    conv_b = jax.random.uniform(ks[3], (1,), jnp.float32, -conv_bound, conv_bound)
    conv = jnp.concatenate([conv_w, conv_b]).reshape(1, 4)
    w2, b2 = linear(ks[4], ks[5], H1, H2)
    w3, b3 = linear(ks[6], ks[7], H2, H3)
    w4, b4 = linear(ks[8], ks[9], H3, E)
    pool = adaptive_avg_pool1d_matrix(H0 - 2, H1)
    return dict(conv=conv, w1=w1, b1=b1, pool=pool,
                w2=w2, b2=b2, w3=w3, b3=b3, w4=w4, b4=b4)


def prepare_params(p):
    """One-time prep: exact algebraic fold of fc1+Conv1d+AdaptiveAvgPool1d,
    transpose every weight to output-major (so batch lives on lanes in-kernel),
    and cast matmul operands to bf16 (biases stay f32)."""
    W1, b1 = p["w1"], p["b1"]             # (2E, H0), (1, H0)
    cw = p["conv"]                         # (1, 4) = [w0, w1, w2, conv_bias]
    P = p["pool"]                          # (H0-2, H1)
    L = W1.shape[1] - 2
    w0, w1c, w2c, cb = cw[0, 0], cw[0, 1], cw[0, 2], cw[0, 3]
    Wc = w0 * W1[:, 0:L] + w1c * W1[:, 1:L + 1] + w2c * W1[:, 2:L + 2]        # (2E, L)
    bc = w0 * b1[:, 0:L] + w1c * b1[:, 1:L + 1] + w2c * b1[:, 2:L + 2] + cb   # (1, L)
    W_fused = Wc @ P                       # (2E, H1)
    b_fused = bc @ P                       # (1, H1)
    return dict(
        wf=jnp.asarray(W_fused.T, jnp.bfloat16),   # (H1, 2E)
        bf=jnp.asarray(b_fused.T, jnp.float32),    # (H1, 1)
        w2=jnp.asarray(p["w2"].T, jnp.bfloat16),   # (H2, H1)
        b2=jnp.asarray(p["b2"].T, jnp.float32),    # (H2, 1)
        w3=jnp.asarray(p["w3"].T, jnp.bfloat16),   # (H3, H2)
        b3=jnp.asarray(p["b3"].T, jnp.float32),    # (H3, 1)
        w4=jnp.asarray(p["w4"].T, jnp.bfloat16),   # (E,  H3)
        b4=jnp.asarray(p["b4"].T, jnp.float32),    # (E,  1)
    )


# ------------------------------ forward pass --------------------------------
def textdnn_forward(x, prep, *, tb_max=8192):
    B, in_dim = x.shape
    E = prep["w4"].shape[0]

    # Batch lives on the lane axis inside the kernel -> pad only to a multiple
    # of 128 (<=127 rows of waste), NOT to a full multiple of the batch tile.
    B_pad = _round_up(max(B, 1), 128)
    TB = min(tb_max, B_pad)                        # big tile amortizes step overhead
    num_steps = pl.cdiv(B_pad, TB)                 # partial last block handled by Pallas

    # (B, 2E) -> zero-pad batch -> transpose -> bf16: (2E, B_pad), batch on lanes.
    xT = jnp.pad(x, ((0, B_pad - B), (0, 0))).T.astype(jnp.bfloat16)

    def resident(arr):
        # Full-array block with constant index_map: loaded once, stays in VMEM.
        return pl.BlockSpec(arr.shape, lambda i: (0, 0))

    # Deeper input pipelining only when there are enough grid steps for it.
    x_spec_kwargs = dict(pipeline_mode=pl.Buffered(3)) if num_steps >= 3 else {}

    outT = pl.pallas_call(
        textdnn_kernel,
        out_shape=jax.ShapeDtypeStruct((E, B_pad), jnp.float32),
        grid=(num_steps,),
        in_specs=[
            pl.BlockSpec((in_dim, TB), lambda i: (0, i), **x_spec_kwargs),  # x, pipelined
            resident(prep["wf"]), resident(prep["bf"]),
            resident(prep["w2"]), resident(prep["b2"]),
            resident(prep["w3"]), resident(prep["b3"]),
            resident(prep["w4"]), resident(prep["b4"]),
        ],
        out_specs=pl.BlockSpec((E, TB), lambda i: (0, i)),   # lane-dense output
        compiler_params=pltpu.CompilerParams(
            dimension_semantics=("parallel",)),
    )(xT, prep["wf"], prep["bf"], prep["w2"], prep["b2"],
      prep["w3"], prep["b3"], prep["w4"], prep["b4"])

    # (E, B_pad) -> drop padded columns -> (B, E)
    return outT[:, :B].T


# ------------------------- pure-JAX unfused reference -----------------------
def reference_forward(x, p):
    """Unfused f32 reference matching the PyTorch module exactly."""
    h = x @ p["w1"] + p["b1"]
    L = h.shape[1] - 2
    cw = p["conv"]
    conv = (cw[0, 0] * h[:, 0:L] + cw[0, 1] * h[:, 1:L + 1]
            + cw[0, 2] * h[:, 2:L + 2] + cw[0, 3])
    h = jax.nn.relu(conv @ p["pool"])
    h = jax.nn.relu(h @ p["w2"] + p["b2"])
    h = jax.nn.relu(h @ p["w3"] + p["b3"])
    return h @ p["w4"] + p["b4"]


if __name__ == "__main__":
    # Small shapes consistent with the module.
    B = 4
    E, H0, H1, H2, H3 = 16, 64, 32, 32, 16

    key = jax.random.PRNGKey(0)
    k_x, k_p = jax.random.split(key)
    x = jax.random.normal(k_x, (B, 2 * E), jnp.float32)
    params = init_params(k_p, E, H0, H1, H2, H3)
    prep = prepare_params(params)            # one-time: fuse/transpose/cast

    fwd = jax.jit(textdnn_forward)
    out = jax.block_until_ready(fwd(x, prep))
    ref = jax.block_until_ready(reference_forward(x, params))

    assert out.shape == (B, E)
    # bf16 matmul operands with f32 accumulation -> small numerical delta vs.
    # the full-f32 reference; tolerance loosened accordingly.
    np.testing.assert_allclose(np.asarray(out), np.asarray(ref), rtol=5e-2, atol=5e-2)
    print("KERNEL_OK")
</pallas_src>

<mosaic_0001>
module attributes {stable_mosaic.version = 11 : i64} {
  func.func @textdnn_kernel(%arg0: i32, %arg1: memref<32x128xbf16, #tpu.memory_space<vmem>>, %arg2: memref<32x32xbf16, #tpu.memory_space<vmem>>, %arg3: memref<32x1xf32, #tpu.memory_space<vmem>>, %arg4: memref<32x32xbf16, #tpu.memory_space<vmem>>, %arg5: memref<32x1xf32, #tpu.memory_space<vmem>>, %arg6: memref<16x32xbf16, #tpu.memory_space<vmem>>, %arg7: memref<16x1xf32, #tpu.memory_space<vmem>>, %arg8: memref<16x16xbf16, #tpu.memory_space<vmem>>, %arg9: memref<16x1xf32, #tpu.memory_space<vmem>>, %arg10: memref<16x128xf32, #tpu.memory_space<vmem>>) attributes {dimension_semantics = [#tpu.dimension_semantics<parallel>], iteration_bounds = array<i64: 1>, scalar_prefetch = 0 : i64, scratch_operands = 0 : i64, tpu.core_type = #tpu.core_type<tc>, window_params = [{transform_indices = @transform_0, window_bounds = array<i64: 32, 128>}, {pipeline_mode = #tpu.pipeline_mode<synchronous>, transform_indices = @transform_1, window_bounds = array<i64: 32, 32>}, {pipeline_mode = #tpu.pipeline_mode<synchronous>, transform_indices = @transform_2, window_bounds = array<i64: 32, 1>}, {pipeline_mode = #tpu.pipeline_mode<synchronous>, transform_indices = @transform_3, window_bounds = array<i64: 32, 32>}, {pipeline_mode = #tpu.pipeline_mode<synchronous>, transform_indices = @transform_4, window_bounds = array<i64: 32, 1>}, {pipeline_mode = #tpu.pipeline_mode<synchronous>, transform_indices = @transform_5, window_bounds = array<i64: 16, 32>}, {pipeline_mode = #tpu.pipeline_mode<synchronous>, transform_indices = @transform_6, window_bounds = array<i64: 16, 1>}, {pipeline_mode = #tpu.pipeline_mode<synchronous>, transform_indices = @transform_7, window_bounds = array<i64: 16, 16>}, {pipeline_mode = #tpu.pipeline_mode<synchronous>, transform_indices = @transform_8, window_bounds = array<i64: 16, 1>}, {transform_indices = @transform_9, window_bounds = array<i64: 16, 128>}]} {
    %c0 = arith.constant 0 : index
    %c0_0 = arith.constant 0 : index
    %0 = vector.load %arg1[%c0, %c0_0] : memref<32x128xbf16, #tpu.memory_space<vmem>>, vector<32x128xbf16>
    %c0_1 = arith.constant 0 : index
    %c0_2 = arith.constant 0 : index
    %1 = vector.load %arg2[%c0_1, %c0_2] : memref<32x32xbf16, #tpu.memory_space<vmem>>, vector<32x32xbf16>
    %cst = arith.constant dense<0.000000e+00> : vector<32x128xf32>
    %2 = tpu.matmul %1, %0, %cst {dimension_numbers = #tpu.dot_dimension_numbers<[1], [0], [0], [1], [0, 0, 1, 1], [], []>} : vector<32x32xbf16>, vector<32x128xbf16>, vector<32x128xf32> -> vector<32x128xf32>
    %c0_3 = arith.constant 0 : index
    %c0_4 = arith.constant 0 : index
    %3 = vector.load %arg3[%c0_3, %c0_4] : memref<32x1xf32, #tpu.memory_space<vmem>>, vector<32x1xf32>
    %4 = vector.broadcast %3 : vector<32x1xf32> to vector<32x128xf32>
    %5 = arith.addf %2, %4 : vector<32x128xf32>
    %cst_5 = arith.constant 0.000000e+00 : f32
    %6 = vector.broadcast %cst_5 : f32 to vector<32x128xf32>
    %7 = arith.maximumf %5, %6 : vector<32x128xf32>
    %c0_6 = arith.constant 0 : index
    %c0_7 = arith.constant 0 : index
    %8 = vector.load %arg4[%c0_6, %c0_7] : memref<32x32xbf16, #tpu.memory_space<vmem>>, vector<32x32xbf16>
    %9 = arith.truncf %7 : vector<32x128xf32> to vector<32x128xbf16>
    %cst_8 = arith.constant dense<0.000000e+00> : vector<32x128xf32>
    %10 = tpu.matmul %8, %9, %cst_8 {dimension_numbers = #tpu.dot_dimension_numbers<[1], [0], [0], [1], [0, 0, 1, 1], [], []>} : vector<32x32xbf16>, vector<32x128xbf16>, vector<32x128xf32> -> vector<32x128xf32>
    %c0_9 = arith.constant 0 : index
    %c0_10 = arith.constant 0 : index
    %11 = vector.load %arg5[%c0_9, %c0_10] : memref<32x1xf32, #tpu.memory_space<vmem>>, vector<32x1xf32>
    %12 = vector.broadcast %11 : vector<32x1xf32> to vector<32x128xf32>
    %13 = arith.addf %10, %12 : vector<32x128xf32>
    %cst_11 = arith.constant 0.000000e+00 : f32
    %14 = vector.broadcast %cst_11 : f32 to vector<32x128xf32>
    %15 = arith.maximumf %13, %14 : vector<32x128xf32>
    %c0_12 = arith.constant 0 : index
    %c0_13 = arith.constant 0 : index
    %16 = vector.load %arg6[%c0_12, %c0_13] : memref<16x32xbf16, #tpu.memory_space<vmem>>, vector<16x32xbf16>
    %17 = arith.truncf %15 : vector<32x128xf32> to vector<32x128xbf16>
    %cst_14 = arith.constant dense<0.000000e+00> : vector<16x128xf32>
    %18 = tpu.matmul %16, %17, %cst_14 {dimension_numbers = #tpu.dot_dimension_numbers<[1], [0], [0], [1], [0, 0, 1, 1], [], []>} : vector<16x32xbf16>, vector<32x128xbf16>, vector<16x128xf32> -> vector<16x128xf32>
    %c0_15 = arith.constant 0 : index
    %c0_16 = arith.constant 0 : index
    %19 = vector.load %arg7[%c0_15, %c0_16] : memref<16x1xf32, #tpu.memory_space<vmem>>, vector<16x1xf32>
    %20 = vector.broadcast %19 : vector<16x1xf32> to vector<16x128xf32>
    %21 = arith.addf %18, %20 : vector<16x128xf32>
    %cst_17 = arith.constant 0.000000e+00 : f32
    %22 = vector.broadcast %cst_17 : f32 to vector<16x128xf32>
    %23 = arith.maximumf %21, %22 : vector<16x128xf32>
    %c0_18 = arith.constant 0 : index
    %c0_19 = arith.constant 0 : index
    %24 = vector.load %arg8[%c0_18, %c0_19] : memref<16x16xbf16, #tpu.memory_space<vmem>>, vector<16x16xbf16>
    %25 = arith.truncf %23 : vector<16x128xf32> to vector<16x128xbf16>
    %cst_20 = arith.constant dense<0.000000e+00> : vector<16x128xf32>
    %26 = tpu.matmul %24, %25, %cst_20 {dimension_numbers = #tpu.dot_dimension_numbers<[1], [0], [0], [1], [0, 0, 1, 1], [], []>} : vector<16x16xbf16>, vector<16x128xbf16>, vector<16x128xf32> -> vector<16x128xf32>
    %c0_21 = arith.constant 0 : index
    %c0_22 = arith.constant 0 : index
    %27 = vector.load %arg9[%c0_21, %c0_22] : memref<16x1xf32, #tpu.memory_space<vmem>>, vector<16x1xf32>
    %28 = vector.broadcast %27 : vector<16x1xf32> to vector<16x128xf32>
    %29 = arith.addf %26, %28 : vector<16x128xf32>
    %c0_23 = arith.constant 0 : index
    %c0_24 = arith.constant 0 : index
    %30 = vector.load %arg10[%c0_23, %c0_24] : memref<16x128xf32, #tpu.memory_space<vmem>>, vector<16x128xf32>
    tpu.vector_store %arg10[%c0_23, %c0_24], %29 {strides = array<i32>} : memref<16x128xf32, #tpu.memory_space<vmem>>, vector<16x128xf32>,
    return
  }
  func.func @transform_0(%arg0: i32) -> (i32, i32) {
    %c0_i32 = arith.constant 0 : i32
    %c0_i32_0 = arith.constant 0 : i32
    return %c0_i32, %arg0 : i32, i32
  }
  func.func @transform_1(%arg0: i32) -> (i32, i32) {
    %c0_i32 = arith.constant 0 : i32
    %c0_i32_0 = arith.constant 0 : i32
    %c0_i32_1 = arith.constant 0 : i32
    return %c0_i32, %c0_i32_0 : i32, i32
  }
  func.func @transform_2(%arg0: i32) -> (i32, i32) {
    %c0_i32 = arith.constant 0 : i32
    %c0_i32_0 = arith.constant 0 : i32
    %c0_i32_1 = arith.constant 0 : i32
    return %c0_i32, %c0_i32_0 : i32, i32
  }
  func.func @transform_3(%arg0: i32) -> (i32, i32) {
    %c0_i32 = arith.constant 0 : i32
    %c0_i32_0 = arith.constant 0 : i32
    %c0_i32_1 = arith.constant 0 : i32
    return %c0_i32, %c0_i32_0 : i32, i32
  }
  func.func @transform_4(%arg0: i32) -> (i32, i32) {
    %c0_i32 = arith.constant 0 : i32
    %c0_i32_0 = arith.constant 0 : i32
    %c0_i32_1 = arith.constant 0 : i32
    return %c0_i32, %c0_i32_0 : i32, i32
  }
  func.func @transform_5(%arg0: i32) -> (i32, i32) {
    %c0_i32 = arith.constant 0 : i32
    %c0_i32_0 = arith.constant 0 : i32
    %c0_i32_1 = arith.constant 0 : i32
    return %c0_i32, %c0_i32_0 : i32, i32
  }
  func.func @transform_6(%arg0: i32) -> (i32, i32) {
    %c0_i32 = arith.constant 0 : i32
    %c0_i32_0 = arith.constant 0 : i32
    %c0_i32_1 = arith.constant 0 : i32
    return %c0_i32, %c0_i32_0 : i32, i32
  }
  func.func @transform_7(%arg0: i32) -> (i32, i32) {
    %c0_i32 = arith.constant 0 : i32
    %c0_i32_0 = arith.constant 0 : i32
    %c0_i32_1 = arith.constant 0 : i32
    return %c0_i32, %c0_i32_0 : i32, i32
  }
  func.func @transform_8(%arg0: i32) -> (i32, i32) {
    %c0_i32 = arith.constant 0 : i32
    %c0_i32_0 = arith.constant 0 : i32
    %c0_i32_1 = arith.constant 0 : i32
    return %c0_i32, %c0_i32_0 : i32, i32
  }
  func.func @transform_9(%arg0: i32) -> (i32, i32) {
    %c0_i32 = arith.constant 0 : i32
    %c0_i32_0 = arith.constant 0 : i32
    return %c0_i32, %arg0 : i32, i32
  }
}

</mosaic_0001>

<bundles_post_ra>
// kernel: textdnn_forward.1
= control target key start
LH: loop header
LB: loop body
LE: loop exit
PB: predicated region body
PF: predicated region fallthrough
CT: control target
= control target key end

     0   :  { %v454_v1 = vmov 0   ;;  %vm87_vm0 = vcmask 261120   ;;  %v455_v37 = vmov 0.0   ;;  %vm456_vm1 = vmmov 0   ;;  %s578_s0 = inlined_call_operand.vmem [shape: bf16[32,128], index: 0, kind: input, shape index: {}]   ;;  %s579_s1 = inlined_call_operand.vmem [shape: bf16[32,32], index: 1, kind: input, shape index: {}]   ;;  %s580_s2 = inlined_call_operand.vmem [shape: f32[32,1], index: 2, kind: input, shape index: {}]   ;;  %s581_s4 = inlined_call_operand.vmem [shape: f32[32,1], index: 4, kind: input, shape index: {}]   ;;  %s582_s6 = inlined_call_operand.vmem [shape: f32[16,1], index: 6, kind: input, shape index: {}]   ;;  %s583_s8 = inlined_call_operand.vmem [shape: f32[16,1], index: 8, kind: input, shape index: {}]   ;;  %s584_s3 = inlined_call_operand.vmem [shape: bf16[32,32], index: 3, kind: input, shape index: {}]   ;;  %s585_s5 = inlined_call_operand.vmem [shape: bf16[16,32], index: 5, kind: input, shape index: {}]   ;;  %s586_s7 = inlined_call_operand.vmem [shape: bf16[16,16], index: 7, kind: input, shape index: {}]   ;;  %s587_s9 = inlined_call_operand.vmem [shape: f32[16,128], index: 9, kind: output, shape index: {}]  }
   0x1   :  { %v446_v0 = vld [vmem:[%s578_s0] sm:$0xff]   ;;  %444 = vset.pattern.permute.xlu0 %v454_v1  ;;  %445 = vset.pattern.permute.xlu1 %v454_v1  ;;  %v447_v2 = vld [vmem:[%s578_s0 + $0x8] sm:$0xff]   ;;  %v43_v5 = vld [vmem:[%s580_s2 + $0x10] sm:$0xff]  ;;  %vm333_vm2 = vcmask 130048  }
   0x2   :  { %411 = vmatprep.subr.bf16.mxu0 %v446_v0  ;;  %v448_v3 = vld [vmem:[%s579_s1] sm:$0xff]   ;;  %57 = vperm.xlu1 %445, %v43_v5   ;;  %v449_v6 = vld [vmem:[%s579_s1 + $0x8] sm:$0xff]   ;;  %v44_v8 = vld [vmem:[%s580_s2 + $0x18] sm:$0xff] }
   0x3   :  { %412 = vmatpush3.bf16.msra.mxu0 %v446_v0  ;;  %415 = vmatprep.mubr.msk.bf16.mxu0 %vm87_vm0, %v448_v3  ;;  %v41_v4 = vld [vmem:[%s580_s2] sm:$0xff]  ;;  %v42_v7 = vld [vmem:[%s580_s2 + $0x8] sm:$0xff]  ;;  %v155_v11 = vld [vmem:[%s581_s4 + $0x10] sm:$0xff] }
   0x4   :  { %413 = vmatprep.subr.bf16.mxu0 %v447_v2  ;;  %47 = vperm.xlu0 %444, %v41_v4   ;;  %v153_v9 = vld [vmem:[%s581_s4] sm:$0xff]  ;;  %v154_v10 = vld [vmem:[%s581_s4 + $0x8] sm:$0xff]  ;;  %v156_v12 = vld [vmem:[%s581_s4 + $0x18] sm:$0xff] }
   0x5   :  { %v250_v13 = vld [vmem:[%s582_s6] sm:$0xff]  ;;  %v251_v14 = vld [vmem:[%s582_s6 + $0x8] sm:$0xff] }
   0x6   :  { %62 = vperm.xlu1 %445, %v44_v8   ;;  %v316_v15 = vld [vmem:[%s583_s8] sm:$0xff]  ;;  %v317_v16 = vld [vmem:[%s583_s8 + $0x8] sm:$0xff] }
   0x7   :  { %414 = vmatpush3.bf16.msra.mxu0 %v447_v2  ;;  %v450_v17 = vld [vmem:[%s584_s3] sm:$0xff]   ;;  %v451_v36 = vld [vmem:[%s584_s3 + $0x8] sm:$0xff]  }
   0x8   :  { %52 = vperm.xlu0 %444, %v42_v7   ;;  %423 = vmatprep.mubr.msk.bf16.mxu1 %vm87_vm0, %v450_v17  ;;  %v452_v56 = vld [vmem:[%s585_s5] sm:$0xff]  }
   0x9   :  { %427 = vmatprep.subr.bf16.mxu0 %v455_v37  ;;  %v453_v4 = vld [vmem:[%s586_s7] sm:$0xff]  }
   0xa   :  { %416 = vmatmul.mubr.msk.bf16.vlgmr.msra.gmra.mrb[0].mxu0 %vm87_vm0, %v449_v6  ;;  %164 = vperm.xlu1 %445, %v154_v10  }
   0xb   :  { %431 = vmatprep.mubr.msk.bf16.mxu0 %vm456_vm1, %v455_v37 }
   0xc   :  { %159 = vperm.xlu0 %444, %v153_v9  }
   0xe   :  { %174 = vperm.xlu1 %445, %v156_v12  }
  0x10   :  { %169 = vperm.xlu0 %444, %v155_v11  }
  0x12   :  { %259 = vperm.xlu1 %445, %v251_v14  }
  0x14   :  { %254 = vperm.xlu0 %444, %v250_v13  }
  0x16   :  { %325 = vperm.xlu1 %445, %v317_v16  }
  0x18   :  { %320 = vperm.xlu0 %444, %v316_v15  }
  0x81   :  { %v58_v18 = vpop.permute.xlu1 %57 }
  0x83   :  { %v48_v19 = vpop.permute.xlu0 %47 }
  0x85   :  { %v63_v23 = vpop.permute.xlu1 %62 }
  0x87   :  { %v53_v26 = vpop.permute.xlu0 %52 }
  0x89   :  { %v165_v39 = vpop.permute.xlu1 %164 }
  0x8b   :  { %v160_v38 = vpop.permute.xlu0 %159 }
  0x8d   :  { %v175_v44 = vpop.permute.xlu1 %174 }
  0x8f   :  { %v170_v40 = vpop.permute.xlu0 %169 }
  0x91   :  { %v260_v61 = vpop.permute.xlu1 %259 }
  0x93   :  { %v255_v57 = vpop.permute.xlu0 %254 }
  0x95   :  { %v326_v9 = vpop.permute.xlu1 %325 }
  0x97   :  { %v321_v5 = vpop.permute.xlu0 %320 }
  0xdd   :  { %v417_v20 = vpop.f32.mrb[0].mxu0 }
  0xde   :  { %v137_v21 = vadd.f32 %v417_v20, %v58_v18  ;;  %v128_v22 = vpop.f32.mrb[1].mxu0 }
  0xdf   :  { %v129_v24 = vadd.f32 %v128_v22, %v48_v19  ;;  %v418_v25 = vpop.f32.mrb[2].mxu0 }
  0xe0   :  { %v140_v27 = vadd.f32 %v418_v25, %v63_v23  ;;  %v131_v28 = vpop.f32.mrb[3].mxu0  ;;  %v145_v30 = vmax.f32 %v137_v21, 0.0 }
  0xe1   :  { %v132_v29 = vadd.f32 %v131_v28, %v53_v26  ;;  %v143_v32 = vmax.f32 %v129_v24, 0.0 }
  0xe2   :  { %v146_v31 = vmax.f32 %v140_v27, 0.0 }
  0xe3   :  { %v144_v33 = vmax.f32 %v132_v29, 0.0 }
  0xe4   :  { %v152_v34 = vpack.c.bf16 %v146_v31, %v145_v30 }
  0xe5   :  { %v151_v35 = vpack.c.bf16 %v144_v33, %v143_v32 }
  0xe7   :  { %419 = vmatprep.subr.bf16.mxu1 %v151_v35 }
  0xe8   :  { %420 = vmatpush3.bf16.msra.mxu1 %v151_v35 }
  0xe9   :  { %421 = vmatprep.subr.bf16.mxu1 %v152_v34 }
  0xec   :  { %422 = vmatpush3.bf16.msra.mxu1 %v152_v34 }
  0xed   :  { %435 = vmatprep.subr.bf16.mxu1 %v455_v37 }
  0xef   :  { %424 = vmatmul.mubr.msk.bf16.vlgmr.msra.gmra.mrb[0].mxu1 %vm87_vm0, %v451_v36 }
  0xf0   :  { %437 = vmatprep.mubr.msk.bf16.mxu1 %vm456_vm1, %v455_v37 }
 0x1c2   :  { %v425_v41 = vpop.f32.mrb[0].mxu1 }
 0x1c3   :  { %v236_v42 = vadd.f32 %v425_v41, %v170_v40  ;;  %v227_v43 = vpop.f32.mrb[1].mxu1 }
 0x1c4   :  { %v228_v45 = vadd.f32 %v227_v43, %v160_v38  ;;  %v426_v46 = vpop.f32.mrb[2].mxu1 }
 0x1c5   :  { %v239_v47 = vadd.f32 %v426_v46, %v175_v44  ;;  %v230_v48 = vpop.f32.mrb[3].mxu1  ;;  %v244_v50 = vmax.f32 %v236_v42, 0.0 }
 0x1c6   :  { %v231_v49 = vadd.f32 %v230_v48, %v165_v39  ;;  %v242_v52 = vmax.f32 %v228_v45, 0.0 }
 0x1c7   :  { %v245_v51 = vmax.f32 %v239_v47, 0.0 }
 0x1c8   :  { %v243_v53 = vmax.f32 %v231_v49, 0.0 }
 0x1c9   :  { %v249_v54 = vpack.c.bf16 %v245_v51, %v244_v50 }
 0x1ca   :  { %v248_v55 = vpack.c.bf16 %v243_v53, %v242_v52 }
 0x1cc   :  { %428 = vmatpush3.bf16.msra.mxu0 %v248_v55 }
 0x1cd   :  { %429 = vmatprep.subr.bf16.mxu0 %v455_v37 }
 0x1d0   :  { %430 = vmatpush3.bf16.msra.mxu0 %v249_v54 }
 0x1d3   :  { %432 = vmatmul.mubr.msk.bf16.vlgmr.msra.gmra.mrb[4].mxu0 %vm87_vm0, %v452_v56 }
 0x2a6   :  { %v304_v58 = vpop.f32.mrb[4].mxu0 }
 0x2a7   :  { %v305_v59 = vadd.f32 %v304_v58, %v255_v57  ;;  %v433_v60 = vpop.f32.mrb[5].mxu0 }
 0x2a8   :  { %v307_v62 = vpop.f32.mrb[6].mxu0 }
 0x2a9   :  { %v308_v63 = vadd.f32 %v307_v62, %v260_v61  ;;  %v434_v0 = vpop.f32.mrb[7].mxu0  ;;  %v311_v1 = vmax.f32 %v305_v59, 0.0 }
 0x2ab   :  { %v312_v2 = vmax.f32 %v308_v63, 0.0 }
 0x2ad   :  { %v315_v3 = vpack.c.bf16 %v312_v2, %v311_v1 }
 0x2af   :  { %436 = vmatpush3.bf16.msra.mxu1 %v315_v3 }
 0x2b2   :  { %438 = vmatmul.mubr.msk.bf16.vlgmr.msra.gmra.mrb[4].mxu1 %vm333_vm2, %v453_v4 }
 0x385   :  { %v371_v6 = vpop.f32.mrb[4].mxu1 }
 0x386   :  { %v372_v7 = vadd.f32 %v371_v6, %v321_v5  ;;  %v439_v8 = vpop.f32.mrb[5].mxu1 }
 0x387   :  { %v374_v10 = vpop.f32.mrb[6].mxu1 }
 0x388   :  { %378 = vst [vmem:[%s587_s9] sm:$0xff] %v372_v7  ;;  %v375_v11 = vadd.f32 %v374_v10, %v326_v9  ;;  %v440_v12 = vpop.f32.mrb[7].mxu1 }
 0x38a   :  { %379 = vst [vmem:[%s587_s9 + $0x8] sm:$0xff] %v375_v11 }

</bundles_post_ra>
